<compile_context>
chip_gen: v5e
topology: v5e:2x2
jax: 0.10.0
libtpu: 0.0.40
codegen_flags: <defaults>
</compile_context>

<pallas_src>
import functools
import math

import jax
import jax.numpy as jnp
from jax.experimental import pallas as pl
from jax.experimental.pallas import tpu as pltpu

_BN_EPS = 1e-5
_VMEM_LIMIT = 48 * 1024 * 1024  # fits v7x's 64 MiB/TC with headroom; << v5e/v6e 128 MiB


# --------------------------------------------------------------------------------------
# Kernels
# --------------------------------------------------------------------------------------
def _conv_acc(x_ref, w_ref, *, k_taps, l_out, folded):
    """f32 conv accumulator via MXU matmuls (folded im2col, or K-tap accumulation)."""
    if folded:
        # x_ref: (bn, l_out, K*C_in) prebuilt im2col (lane-sparse C_in, layer 1 only).
        bn, _, kc = x_ref.shape
        xs = x_ref[...].reshape(bn * l_out, kc)
        return jnp.dot(xs, w_ref[...], preferred_element_type=jnp.float32)
    # x_ref: (bn, l_out + K - 1, C_in) already zero-padded; w_ref: (K, C_in, C_out).
    # K-tap accumulation: no K-times im2col copy materialized in VMEM.
    bn, _, c_in = x_ref.shape
    c_out = w_ref.shape[-1]
    acc = jnp.zeros((bn * l_out, c_out), jnp.float32)
    for q in range(k_taps):
        xq = x_ref[:, q:q + l_out, :].reshape(bn * l_out, c_in)
        acc = acc + jnp.dot(xq, w_ref[q], preferred_element_type=jnp.float32)
    return acc


def _conv_stats_kernel(x_ref, w_ref, *out_refs, k_taps, l_out, folded, store_conv):
    """Pass 1: conv matmul -> per-tile BN partials [tile mean, tile M2].

    Stats-only by default (no conv write to HBM); store_conv=True additionally writes the
    bf16 conv activation (two-pass variant for v5e layers 2-3)."""
    acc = _conv_acc(x_ref, w_ref, k_taps=k_taps, l_out=l_out, folded=folded)
    rows, c = acc.shape
    mean = jnp.sum(acc, axis=0, keepdims=True) / rows
    cen = acc - mean
    m2 = jnp.sum(cen * cen, axis=0, keepdims=True)   # mean-centered: no E[x^2]-E[x]^2 loss
    if store_conv:
        conv_ref, stats_ref = out_refs
        conv_ref[...] = acc.reshape(conv_ref.shape).astype(conv_ref.dtype)
    else:
        stats_ref, = out_refs
    stats_ref[...] = jnp.concatenate([mean, m2], axis=0).reshape(1, 2, c)


def _relu_pool_pad(y, *, l_out, l_pool, pad_next):
    """ReLU -> MaxPool1d(3, 2, 1) (zero padding exact post-ReLU) -> fused zero halo of
    width pad_next so the next layer reads an already length-padded activation."""
    bn, _, c = y.shape
    y = jnp.maximum(y, 0.0)
    if l_out % 2:
        y = jnp.concatenate([y, jnp.zeros((bn, 1, c), y.dtype)], axis=1)
    yp = y.reshape(bn, l_pool, 2, c)
    even = yp[:, :, 0, :]                                 # y[2j]
    odd = yp[:, :, 1, :]                                  # y[2j+1]
    if l_pool > 1:                                        # y[2j-1] (0 for j == 0)
        prev_odd = jnp.concatenate(
            [jnp.zeros((bn, 1, c), y.dtype), odd[:, :l_pool - 1, :]], axis=1)
    else:
        prev_odd = jnp.zeros((bn, 1, c), y.dtype)
    pooled = jnp.maximum(jnp.maximum(even, odd), prev_odd)
    if pad_next:
        halo = jnp.zeros((bn, pad_next, c), pooled.dtype)
        pooled = jnp.concatenate([halo, pooled, halo], axis=1)
    return pooled


def _bn_relu_pool_kernel(*refs, k_taps, l_out, l_pool, pad_next, folded, from_conv):
    """Pass 2: conv (recomputed, or re-read in store-conv mode) -> folded BN scale/shift
    -> ReLU -> MaxPool -> one lane-dense store of the halo-padded pooled activation."""
    if from_conv:
        conv_ref, scale_ref, shift_ref, out_ref = refs
        bn, _, c = conv_ref.shape
        y = conv_ref[...].astype(jnp.float32).reshape(bn * l_out, c)
    else:
        x_ref, w_ref, scale_ref, shift_ref, out_ref = refs
        bn = x_ref.shape[0]
        y = _conv_acc(x_ref, w_ref, k_taps=k_taps, l_out=l_out, folded=folded)
        c = y.shape[-1]
    y = y * scale_ref[...].reshape(1, c) + shift_ref[...].reshape(1, c)
    y = y.reshape(bn, l_out, c)
    out_ref[...] = _relu_pool_pad(
        y, l_out=l_out, l_pool=l_pool, pad_next=pad_next).astype(out_ref.dtype)


# --------------------------------------------------------------------------------------
# Per-layer driver
# --------------------------------------------------------------------------------------
def _pick_batch_tile(n, l_out, max_block_rows):
    """Largest batch divisor whose matmul M-dim fits the row budget, preferring >= 2 grid
    steps (keeps both v7x TensorCores busy and the DMA pipeline primed)."""
    fits = [d for d in range(1, n + 1) if n % d == 0 and d * l_out <= max_block_rows]
    if not fits:
        # TODO(synk): add halo'd length tiling so one very long sample never exceeds the
        # row budget / VMEM (fails earliest on v7x's 64 MiB per TensorCore).
        return 1
    multi = [d for d in fits if n // d >= 2]
    return max(multi) if multi else max(fits)


def _conv_block(x, p, *, pad_next, out_dtype, max_block_rows, store_conv):
    """One Conv1d + BatchNorm1d(train stats) + ReLU + MaxPool1d(3,2,1) block.

    x is NLC bf16.  Folded (layer-1) path gets the raw unpadded activation; stride-1
    layers already carry this layer's zero halo (fused into the previous block's output).
    """
    n = x.shape[0]
    k, stride, pad = p["k"], p["stride"], p["pad"]
    c_in, c_out_pad, folded = p["c_in_used"], p["c_out_pad"], p["folded"]

    if folded:
        # Lane-sparse input: build the tiny im2col in XLA; kernel does one matmul.
        l_in = x.shape[1]
        l_out = (l_in + 2 * pad - k) // stride + 1
        x_pad = jnp.pad(x, ((0, 0), (pad, pad), (0, 0)))
        cols = [jax.lax.slice_in_dim(x_pad, q, q + stride * (l_out - 1) + 1,
                                     stride=stride, axis=1) for q in range(k)]
        x_in = jnp.concatenate(cols, axis=-1)                # (n, l_out, K*C_in)
        w = p["w"].reshape(k * c_in, c_out_pad)
    else:
        assert stride == 1
        l_out = x.shape[1] - k + 1                           # input is pre-padded
        x_in = x
        w = p["w"]                                           # (K, C_in, C_out)
    l_pool = (l_out + 1) // 2                                # MaxPool1d(3,2,1) length

    bn = _pick_batch_tile(n, l_out, max_block_rows)
    grid_n = n // bn

    if folded:
        x_spec = pl.BlockSpec((bn, l_out, k * c_in), lambda i: (i, 0, 0))
        w_spec = pl.BlockSpec((k * c_in, c_out_pad), lambda i: (0, 0))
    else:
        x_spec = pl.BlockSpec((bn, x_in.shape[1], c_in), lambda i: (i, 0, 0))
        w_spec = pl.BlockSpec((k, c_in, c_out_pad), lambda i: (0, 0, 0))

    cparams = pltpu.CompilerParams(dimension_semantics=("parallel",),
                                   vmem_limit_bytes=_VMEM_LIMIT)

    # ---- pass 1: conv matmul -> per-tile BN partials (stats-only unless store_conv) ---
    stats_shape = jax.ShapeDtypeStruct((grid_n, 2, c_out_pad), jnp.float32)
    stats_spec = pl.BlockSpec((1, 2, c_out_pad), lambda i: (i, 0, 0))
    p1_kernel = functools.partial(_conv_stats_kernel, k_taps=k, l_out=l_out,
                                  folded=folded, store_conv=store_conv)
    if store_conv:
        conv_out, stats = pl.pallas_call(
            p1_kernel,
            out_shape=(jax.ShapeDtypeStruct((n, l_out, c_out_pad), jnp.bfloat16),
                       stats_shape),
            grid=(grid_n,), in_specs=[x_spec, w_spec],
            out_specs=(pl.BlockSpec((bn, l_out, c_out_pad), lambda i: (i, 0, 0)),
                       stats_spec),
            compiler_params=cparams)(x_in, w)
    else:
        stats = pl.pallas_call(
            p1_kernel, out_shape=stats_shape, grid=(grid_n,),
            in_specs=[x_spec, w_spec], out_specs=stats_spec,
            compiler_params=cparams)(x_in, w)

    # ---- glue: combine per-tile (mean, M2) -> biased batch stats -> BN scale/shift ----
    rows_tile = bn * l_out
    count = n * l_out
    tile_mean = stats[:, 0, :]
    mean = jnp.mean(tile_mean, axis=0)
    var = (jnp.sum(stats[:, 1, :], axis=0)
           + rows_tile * jnp.sum(jnp.square(tile_mean - mean), axis=0)) / count
    var = jnp.maximum(var, 0.0)
    # TODO(synk): PyTorch training-mode BatchNorm1d also updates running_mean/running_var
    # (unbiased); those buffers are a side effect, not part of the forward output.
    scale_v = p["gamma"] * jax.lax.rsqrt(var + _BN_EPS)
    shift_v = p["beta"] - mean * scale_v
    scale2 = scale_v.reshape(1, c_out_pad).astype(jnp.float32)
    shift2 = shift_v.reshape(1, c_out_pad).astype(jnp.float32)
    s_spec = pl.BlockSpec((1, c_out_pad), lambda i: (0, 0))

    # ---- pass 2: conv (recompute / re-read) -> BN -> ReLU -> pool -> padded store -----
    l_out_next = l_pool + 2 * pad_next
    p2_kernel = functools.partial(_bn_relu_pool_kernel, k_taps=k, l_out=l_out,
                                  l_pool=l_pool, pad_next=pad_next, folded=folded,
                                  from_conv=store_conv)
    if store_conv:
        in_specs = [pl.BlockSpec((bn, l_out, c_out_pad), lambda i: (i, 0, 0)),
                    s_spec, s_spec]
        args = (conv_out, scale2, shift2)
    else:
        in_specs = [x_spec, w_spec, s_spec, s_spec]
        args = (x_in, w, scale2, shift2)
    return pl.pallas_call(
        p2_kernel,
        out_shape=jax.ShapeDtypeStruct((n, l_out_next, c_out_pad), out_dtype),
        grid=(grid_n,), in_specs=in_specs,
        out_specs=pl.BlockSpec((bn, l_out_next, c_out_pad), lambda i: (i, 0, 0)),
        compiler_params=cparams)(*args)


# --------------------------------------------------------------------------------------
# Parameters & public forward
# --------------------------------------------------------------------------------------
def init_params(key, input_channels, embedding_dim=128):
    """Deterministic parameter init mirroring the PyTorch module's layer shapes."""
    layer_specs = [
        # (c_in, c_out, kernel, stride, padding)
        (input_channels, 64, 7, 2, 3),
        (64, 128, 5, 1, 2),
        (128, embedding_dim, 3, 1, 1),
    ]
    params = []
    for (cin, cout, k, stride, pad) in layer_specs:
        key, kw, kb = jax.random.split(key, 3)
        bound = 1.0 / math.sqrt(cin * k)                 # PyTorch-style uniform bound
        params.append(dict(
            w=jax.random.uniform(kw, (k, cin, cout), jnp.float32, -bound, bound),
            # Conv bias kept for shape fidelity but unused: training-mode BatchNorm
            # subtracts the batch mean, which cancels the bias exactly.
            b=jax.random.uniform(kb, (cout,), jnp.float32, -bound, bound),
            gamma=jnp.ones((cout,), jnp.float32),        # BN default init
            beta=jnp.zeros((cout,), jnp.float32),
            stride=stride, pad=pad))
    return params


def _round_up(x, m):
    return (x + m - 1) // m * m


def prepare_params(raw_params):
    """Zero-pad channel dims to multiples of 128 (lane-dense, provably inert) and keep
    conv weights as (K, C_in, C_out) bf16 for the K-tap matmul loop."""
    prepared = []
    c_in_used = raw_params[0]["w"].shape[1]              # layer-0 input stays unpadded
    for li, p in enumerate(raw_params):
        k, c_in, c_out = p["w"].shape
        c_out_pad = _round_up(c_out, 128)
        folded = (li == 0) or (p["stride"] != 1) or (c_in_used % 128 != 0)
        w = jnp.pad(p["w"], ((0, 0), (0, c_in_used - c_in), (0, c_out_pad - c_out)))
        prepared.append(dict(
            w=w.astype(jnp.bfloat16),                    # (K, C_in_used, C_out_pad)
            gamma=jnp.pad(p["gamma"], (0, c_out_pad - c_out)),  # 0 => padded chans stay 0
            beta=jnp.pad(p["beta"], (0, c_out_pad - c_out)),
            k=k, stride=p["stride"], pad=p["pad"], folded=folded,
            c_in_used=c_in_used, c_out=c_out, c_out_pad=c_out_pad))
        c_in_used = c_out_pad
    return prepared


def cnn_feature_extractor(x_ncl, params, *, max_block_rows=2048, store_conv_layers=()):
    """Forward pass: PyTorch NCL (N, C, L) f32 -> (N, embedding_dim, L // 16) f32.

    store_conv_layers: layer indices that write the conv activation to HBM between the
    two passes instead of recomputing it (default () = fully fused; best on v6e/v7x).
    On v5e pass (1, 2) so the MXU-heavier layers 2-3 keep the original two-pass shape.
    """
    x = jnp.transpose(x_ncl, (0, 2, 1)).astype(jnp.bfloat16)     # NCL -> NLC, bf16 acts
    for li, p in enumerate(params):
        last = li == len(params) - 1
        if last:
            pad_next = 0
        else:
            nxt = params[li + 1]
            pad_next = 0 if nxt["folded"] else nxt["pad"]         # fuse next layer's pad
        x = _conv_block(x, p, pad_next=pad_next,
                        out_dtype=jnp.float32 if last else jnp.bfloat16,
                        max_block_rows=max_block_rows,
                        store_conv=li in store_conv_layers)
    x = x[..., :params[-1]["c_out"]]                             # drop inert channel pad
    return jnp.transpose(x, (0, 2, 1))                           # NLC -> NCL


if __name__ == "__main__":
    key = jax.random.PRNGKey(0)
    kx, kp = jax.random.split(key)

    N, C_IN, L_IN, EMB = 4, 4, 32, 128
    x = jax.random.normal(kx, (N, C_IN, L_IN), jnp.float32)      # PyTorch NCL input
    params = prepare_params(init_params(kp, input_channels=C_IN, embedding_dim=EMB))

    # Small row budget so the toy shapes still exercise multi-step "parallel" grids;
    # the production default (2048) targets big, VMEM-friendly tiles.
    out = cnn_feature_extractor(x, params, max_block_rows=16)
    out = jax.block_until_ready(out)

    # conv(stride 2) + three maxpools(stride 2): L 32 -> 16 -> 8 -> 4 -> 2
    assert out.shape == (N, EMB, L_IN // 16), out.shape
    assert bool(jnp.all(jnp.isfinite(out)))

    # v5e-style variant: store the conv activation for layers 2-3 instead of recomputing
    # it in pass 2; must agree with the fused path up to bf16 rounding of the conv.
    out_v5e = cnn_feature_extractor(x, params, max_block_rows=16,
                                    store_conv_layers=(1, 2))
    out_v5e = jax.block_until_ready(out_v5e)
    assert out_v5e.shape == out.shape
    assert bool(jnp.allclose(out, out_v5e, atol=5e-2, rtol=5e-2))

    print("KERNEL_OK")
</pallas_src>

<mosaic_0001>
module attributes {stable_mosaic.version = 11 : i64} {
  func.func @_conv_stats_kernel(%arg0: i32, %arg1: memref<1x16x28xbf16, #tpu.memory_space<vmem>>, %arg2: memref<28x128xbf16, #tpu.memory_space<vmem>>, %arg3: memref<1x2x128xf32, #tpu.memory_space<vmem>>) attributes {dimension_semantics = [#tpu.dimension_semantics<parallel>], iteration_bounds = array<i64: 4>, scalar_prefetch = 0 : i64, scratch_operands = 0 : i64, tpu.core_type = #tpu.core_type<tc>, window_params = [{transform_indices = @transform_0, window_bounds = array<i64: 1, 16, 28>}, {pipeline_mode = #tpu.pipeline_mode<synchronous>, transform_indices = @transform_1, window_bounds = array<i64: 28, 128>}, {transform_indices = @transform_2, window_bounds = array<i64: 1, 2, 128>}]} {
    %c0 = arith.constant 0 : index
    %c0_0 = arith.constant 0 : index
    %c0_1 = arith.constant 0 : index
    %0 = vector.load %arg1[%c0, %c0_0, %c0_1] : memref<1x16x28xbf16, #tpu.memory_space<vmem>>, vector<1x16x28xbf16>
    %1 = vector.shape_cast %0 : vector<1x16x28xbf16> to vector<16x28xbf16>
    %c0_2 = arith.constant 0 : index
    %c0_3 = arith.constant 0 : index
    %2 = vector.load %arg2[%c0_2, %c0_3] : memref<28x128xbf16, #tpu.memory_space<vmem>>, vector<28x128xbf16>
    %cst = arith.constant dense<0.000000e+00> : vector<16x128xf32>
    %3 = tpu.matmul %1, %2, %cst {dimension_numbers = #tpu.dot_dimension_numbers<[1], [0], [0], [1], [0, 0, 1, 1], [], []>} : vector<16x28xbf16>, vector<28x128xbf16>, vector<16x128xf32> -> vector<16x128xf32>
    %cst_4 = arith.constant dense<0.000000e+00> : vector<128xf32>
    %4 = vector.multi_reduction <add>, %3, %cst_4 [0] : vector<16x128xf32> to vector<128xf32>
    %5 = vector.shape_cast %4 : vector<128xf32> to vector<1x128xf32>
    %cst_5 = arith.constant 1.600000e+01 : f32
    %6 = vector.broadcast %cst_5 : f32 to vector<1x128xf32>
    %7 = arith.divf %5, %6 : vector<1x128xf32>
    %8 = vector.broadcast %7 : vector<1x128xf32> to vector<16x128xf32>
    %9 = arith.subf %3, %8 : vector<16x128xf32>
    %10 = arith.mulf %9, %9 : vector<16x128xf32>
    %cst_6 = arith.constant dense<0.000000e+00> : vector<128xf32>
    %11 = vector.multi_reduction <add>, %10, %cst_6 [0] : vector<16x128xf32> to vector<128xf32>
    %12 = vector.shape_cast %11 : vector<128xf32> to vector<1x128xf32>
    %13 = tpu.concatenate %7, %12 in 0 : vector<1x128xf32>, vector<1x128xf32> -> vector<2x128xf32>
    %14 = vector.shape_cast %13 : vector<2x128xf32> to vector<1x2x128xf32>
    %c0_7 = arith.constant 0 : index
    %c0_8 = arith.constant 0 : index
    %c0_9 = arith.constant 0 : index
    %15 = vector.load %arg3[%c0_7, %c0_8, %c0_9] : memref<1x2x128xf32, #tpu.memory_space<vmem>>, vector<1x2x128xf32>
    tpu.vector_store %arg3[%c0_7, %c0_8, %c0_9], %14 {strides = array<i32>} : memref<1x2x128xf32, #tpu.memory_space<vmem>>, vector<1x2x128xf32>,
    return
  }
  func.func @transform_0(%arg0: i32) -> (i32, i32, i32) {
    %c0_i32 = arith.constant 0 : i32
    %c0_i32_0 = arith.constant 0 : i32
    %c0_i32_1 = arith.constant 0 : i32
    return %arg0, %c0_i32, %c0_i32_0 : i32, i32, i32
  }
  func.func @transform_1(%arg0: i32) -> (i32, i32) {
    %c0_i32 = arith.constant 0 : i32
    %c0_i32_0 = arith.constant 0 : i32
    %c0_i32_1 = arith.constant 0 : i32
    return %c0_i32, %c0_i32_0 : i32, i32
  }
  func.func @transform_2(%arg0: i32) -> (i32, i32, i32) {
    %c0_i32 = arith.constant 0 : i32
    %c0_i32_0 = arith.constant 0 : i32
    %c0_i32_1 = arith.constant 0 : i32
    return %arg0, %c0_i32, %c0_i32_0 : i32, i32, i32
  }
}

</mosaic_0001>

<bundles_post_ra>
// kernel: tpu_custom_call.1
= control target key start
LH: loop header
LB: loop body
LE: loop exit
PB: predicated region body
PF: predicated region fallthrough
CT: control target
= control target key end

     0   :  { %7 = vsyncpa [#allocation3], 0  ;;  %s739_s0 = inlined_call_operand.hbm [shape: bf16[4,16,28], index: 0, kind: input, shape index: {}]   ;;  %s740_s1 = inlined_call_operand.hbm [shape: bf16[28,128], index: 1, kind: input, shape index: {}]   ;;  %s741_s2 = inlined_call_operand.hbm [shape: f32[4,2,128], index: 2, kind: output, shape index: {}]  }
   0x1   :  { %9 = vsyncpa [#allocation3 + $0x1], 0 }
   0x2   :  { %10 = vsyncpa [#allocation6], 0 }
   0x3   :  { %11 = vsyncpa [#allocation4], 0 }
   0x4   :  { %13 = vsyncpa [#allocation4 + $0x1], 0  ;;  %s596_s9 = smov 0   ;;  %s598_s10 = smov 0  }
   0x5   :  { %s600_s11 = smov 0   ;;  %s602_s12 = smov 0  }
   0x6 LB: > { %s617_s13 = sadd.s32 4294967295, %s575_s12   ;;  %s351_s14 = sadd.s32 4294967294, %s575_s12   ;;  %s575_s12 = sphi %s602_s12, %s750_s12   ;;  %s571_s11 = sphi %s600_s11, %s749_s11   ;;  %s567_s10 = sphi %s598_s10, %s748_s10   ;;  %s563_s9 = sphi %s596_s9, %s747_s9  }
   0x7   : > { %p39_p0 = scmp.ne.s32.totalorder %s567_s10, %s563_s9  ;;  %p40_p1 = scmp.eq.s32.totalorder %s617_s13, 0 }
   0x8   : > { %p84_p2 = scmp.eq.s32.totalorder %s617_s13, 3  ;;  %p90_p3 = scmp.eq.s32.totalorder %s351_s14, 3 }
   0x9   : > { %p626_p4 = por %p40_p1, %p39_p0  ;;  %p352_p5 = scmp.ge.s32.totalorder %s575_s12, 1 }
   0xa   : > { %p631_p6 = por %p90_p3, %p39_p0  ;;  %p97_p7 = scmp.lt.s32.totalorder %s575_s12, 5 }
   0xb   : > { %s108_s19 = sshll.u32 %s740_s1, 4  ;;  %s577_s21 = smov [#allocation5]   ;;  %s109_s19 = int_to_ptr.hbm [resolvable:$true] %s108_s19 }
   0xc   : > { %p639_p8 = pnand %p352_p5, %p97_p7  ;;  %s110_s22 = sshll.u32 %s577_s21, 4  ;;  %s111_s22 = int_to_ptr.vmem [resolvable:$true] %s110_s22 }
   0xd   : > { %s648_s23 = sadd.s32 1, %s575_s12   ;;  %s578_s24 = smov 64  }
   0xe   : > { %p391_p9 = pneg %p639_p8  ;;  %s579_s25 = smov 4  }
   0xf   : > { %s23_s26 = ssub.s32 %s575_s12, %s648_s23  ;;  %s26_s27 = sadd.s32 1, %s571_s11 }
  0x10   : > { %p392_p10 = pnand %p391_p9, %p40_p1  ;;  %p24_p11 = scmp.eq.s32.totalorder %s23_s26, 0 }
  0x11   : > { %p33_p12 = scmp.ne.s32.totalorder %s571_s11, %s567_s10  ;;  %p34_p13 = scmp.eq.s32.totalorder %s575_s12, 0 }
  0x12   : > { %394 = dma.hbm_to_vmem [thread:$0]  (!%p392_p10), %s109_s19, 256, %s111_s22, [#allocation6], %s578_s24, %s578_s24, %s579_s25  }
  0x13   : > { %s660_s28 = scalar_select %p24_p11, %s571_s11, %s26_s27  }
  0x14   : > { %p664_p0 = por %p84_p2, %p33_p12  ;;  %p404_p3 = scmp.lt.s32.totalorder %s575_s12, 4 }
  0x15   : > { %s124_s30 = sand.u32 1, %s571_s11   ;;  %s379_s3 = sshll.u32 %s575_s12, 3 }
  0x16   : > { %p35_p5 = por %p34_p13, %p33_p12  ;;  %s355_s4 = sshll.u32 %s124_s30, 3 }
  0x17   : > { %s133_s7 = scalar_lea.hbm %s739_s0, %s379_s3  ;;  %s128_s14 = scalar_lea.vmem [#allocation2], %s355_s4 }
  0x18   : > { %s134_s8 = sshll.u32 %s133_s7, 4  ;;  %s136_s17 = sshll.u32 %s128_s14, 4  ;;  %s135_s8 = int_to_ptr.hbm [resolvable:$true] %s134_s8  ;;  %s137_s17 = int_to_ptr.vmem [resolvable:$true] %s136_s17 }
  0x19   : > { %p674_p7 = pnand %p404_p3, %p35_p5  ;;  %s125_s19 = scalar_lea.sflag [#allocation3], %s124_s30 }
  0x1a   : > { %s475_s21 = sshra.s32 %s135_s8, 4  ;;  %s482_s3 = scalar_lea.hbm %s739_s0, 32  ;;  %s476_s21 = int_to_ptr.hbm [resolvable:$true] %s475_s21 }
  0x1b   : > { %s477_s22 = scalar_lea.hbm %s476_s21, 8  ;;  %p479_p9 = pneg %p674_p7 }
  0x1c   : > { %p478_p2 = scmp.ne.s32.totalorder %s476_s21, %s477_s22  ;;  %p483_p12 = scmp.lt.s32.totalorder %s476_s21, %s739_s0 }
  0x1d   : > { %p484_p13 = scmp.lt.s32.totalorder %s482_s3, %s477_s22 }
  0x1e   : > { %p480_p10 = pnand %p479_p9, %p478_p2 }
  0x1f   : > { %p485_p3 = por %p484_p13, %p483_p12 }
  0x20   : > { %p481_p11 = pneg %p480_p10 }
  0x22   : > { %p486_p5 = pnand %p485_p3, %p481_p11 }
  0x24   : > { %489 = shalt.err (!%p486_p5)
}
  0x25   : > { %398 = dma.hbm_to_vmem [thread:$0]  (!%p674_p7), %s135_s8, 128, %s137_s17, %s125_s19, %s578_s24, %s578_s24, %s579_s25  }
  0x26   : > { %148 = sbr.rel (%p639_p8) target bundleno = 229 (0xe5), region = 28  ;;  %s694_s30 = sand.u32 (!%p639_p8), 1, %s567_s10  }
  0x27   : > { %s359_s6 = sshll.u32 (!%p639_p8), %s694_s30, 3  ;;  %s151_s7 = scalar_lea.sflag (!%p639_p8), [#allocation3], %s694_s30 }
  0x28   : > { %s154_s14 = scalar_lea.vmem (!%p639_p8), [#allocation2], %s359_s6 }
  0x2b   : > { %550 = dma.done.wait (%p626_p4), %s151_s7, 128  }
  0x2c   : > { %552 = vsyncadd (%p626_p4), %s151_s7, 4294967168 }
  0x2d   : > { %554 = dma.done.wait (%p40_p1), [#allocation6], 256  }
  0x2e   : > { %556 = vsyncadd (%p40_p1), [#allocation6], 4294967040  ;;  %v372_v0 = vld [vmem:[#allocation5 + $0x8] sm:$0xf]  ;;  %v382_v1 = vld [vmem:[#allocation5 + $0x8] sm:$0x30] }
  0x2f   : > { %vm208_vm0 = vcmask 1045504   ;;  %v373_v2 = vor.u32 %v382_v1, %v372_v0  ;;  %v381_v4 = vld [vmem:[#allocation5] sm:$0xff]  ;;  %v380_v5 = vld [vmem:[%s154_s14] sm:$0xff]  ;;  %vm204_vm1 = vcmask 228352   ;;  %v580_v6 = vmov 16.0   ;;  %s361_s15 = sshll.u32 %s694_s30, 1 }
  0x30   : > { %443 = vrcp.f32 %v580_v6  ;;  %s376_s20 = sshll.u32 %s617_s13, 1  ;;  %s180_s17 = scalar_lea.vmem [#allocation7], %s361_s15  ;;  %vm252_vm3 = vcmask 1040384  }
  0x31   : > { %v210_v3 = vsel %vm208_vm0, %v373_v2, 0  ;;  %s266_s8 = scalar_lea.hbm %s741_s2, %s376_s20  ;;  %s268_s18 = sshll.u32 %s180_s17, 4  ;;  %s269_s18 = int_to_ptr.vmem [resolvable:$true] %s268_s18 }
  0x32   : > { %218 = vmatpush.bf16.msra.mxu0 %v210_v3  ;;  %s270_s19 = sshll.u32 %s266_s8, 4  ;;  %s256_s21 = scalar_lea.sflag [#allocation4], %s694_s30  ;;  %s271_s19 = int_to_ptr.hbm [resolvable:$true] %s270_s19 }
  0x33   : > { %s519_s22 = sshra.s32 %s271_s19, 4  ;;  %s525_s3 = scalar_lea.hbm %s741_s2, 8  ;;  %s520_s22 = int_to_ptr.hbm [resolvable:$true] %s519_s22 }
  0x34   : > { %s521_s13 = scalar_lea.hbm %s520_s22, 2  ;;  %p526_p7 = scmp.lt.s32.totalorder %s520_s22, %s741_s2 }
  0x35   : > { %p522_p1 = scmp.ne.s32.totalorder %s520_s22, %s521_s13  ;;  %p527_p2 = scmp.lt.s32.totalorder %s525_s3, %s521_s13 }
  0x36   : > { %219 = vmatpush.bf16.msra.mxu0 %v381_v4  ;;  %v444_v8 = vpop.eup %443 }
  0x37   : > { %v234_v9 = vmul.f32 16.0, %v444_v8  ;;  %vm238_vm2 = vweird.f32 %v444_v8  ;;  %p523_p4 = pnand %p522_p1, %p664_p0  ;;  %p528_p9 = por %p527_p2, %p526_p7 }
  0x39   : > { %374 = vmatmul.msk.bf16.vlgmr.msra.gmra.mxu0 %vm204_vm1, %v380_v5  ;;  %v235_v11 = vsub.f32 1.0, %v234_v9  ;;  %p524_p8 = pneg %p523_p4 }
  0x3b   : > { %v236_v14 = vmul.f32 %v444_v8, %v235_v11  ;;  %p529_p10 = pnand %p528_p9, %p524_p8 }
  0x3d   : > { %v237_v17 = vadd.f32 %v444_v8, %v236_v14 }
  0x3f   : > { %v239_v20 = vsel %vm238_vm2, %v444_v8, %v237_v17 }
  0xb6   : > { %v221_v7 = vpop.f32.mrf.mxu0 }
  0xbe   : > { %v223_v10 = vpop.f32.mrf.mxu0 }
  0xbf   : > { %v226_v12 = vadd.f32 %v223_v10, %v221_v7 }
  0xc1   : > { %v227_v13 = vrot.slane %v226_v12, 4 }
  0xc3   : > { %v228_v15 = vadd.f32 %v227_v13, %v226_v12 }
  0xc5   : > { %v229_v16 = vrot.slane %v228_v15, 2 }
  0xc7   : > { %v230_v18 = vadd.f32 %v229_v16, %v228_v15 }
  0xc9   : > { %v231_v19 = vrot.slane %v230_v18, 1 }
  0xcb   : > { %v232_v21 = vadd.f32 %v231_v19, %v230_v18 }
  0xcd   : > { %v240_v22 = vmul.f32 %v239_v20, %v232_v21 }
  0xcf   : > { %v241_v23 = vsub.f32 %v221_v7, %v240_v22  ;;  %v242_v24 = vsub.f32 %v223_v10, %v240_v22 }
  0xd1   : > { %v243_v25 = vmul.f32 %v241_v23, %v241_v23  ;;  %v244_v26 = vmul.f32 %v242_v24, %v242_v24 }
  0xd3   : > { %v245_v27 = vadd.f32 %v244_v26, %v243_v25 }
  0xd5   : > { %v246_v28 = vrot.slane %v245_v27, 4 }
  0xd7   : > { %v247_v29 = vadd.f32 %v246_v28, %v245_v27 }
  0xd9   : > { %v248_v30 = vrot.slane %v247_v29, 2 }
  0xdb   : > { %v249_v31 = vadd.f32 %v248_v30, %v247_v29 }
  0xdd   : > { %v250_v32 = vrot.slane %v249_v31, 1 }
  0xdf   : > { %v251_v33 = vadd.f32 %v250_v32, %v249_v31 }
  0xe1   : > { %v253_v34 = vsel %vm252_vm3, %v240_v22, %v251_v33 }
  0xe2   : > { %254 = vst [vmem:[%s180_s17] sm:$0x3] %v253_v34 }
  0xe3   : > { %532 = shalt.err (!%p529_p10)
}
  0xe4   : > { %389 = dma.vmem_to_hbm [thread:$0]  (%p664_p0), %s269_s18, 32, %s271_s19, %s256_s21  }
  0xe5 PF: > { %p406_p11 = scmp.ge.s32.totalorder %s575_s12, 2  ;;  %s282_s30 = sand.u32 1, %s563_s9  }
  0xe6   : > { %s283_s6 = scalar_lea.sflag [#allocation4], %s282_s30 }
  0xe7   : > { %p400_p12 = pnand %p406_p11, %p631_p6 }
  0xe9   : > { %p401_p13 = pneg %p400_p12 }
  0xeb   : > { %558 = dma.done.wait (%p401_p13), %s283_s6, 32  }
  0xec   : > { %560 = vsyncadd (%p401_p13), %s283_s6, 4294967264  ;;  %p16_p3 = scmp.ge.s32.totalorder %s648_s23, 6   ;;  %s747_s9 = smov %s567_s10 }
  0xed   : > { %s748_s10 = smov %s571_s11  ;;  %s749_s11 = smov %s660_s28 }
  0xee   : > { %s750_s12 = smov %s648_s23  ;;  %18 = sbr.rel (!%p16_p3) target bundleno = 6 (0x6), region = 77 }
  0xf3   :  { %289 = vsyncpa [#allocation3], 1 }
  0xf4   :  { %291 = vsyncpa [#allocation3 + $0x1], 1 }
  0xf5   :  { %292 = vsyncpa [#allocation6], 1 }
  0xf6   :  { %293 = vsyncpa [#allocation4], 1 }
  0xf7   :  { %295 = vsyncpa [#allocation4 + $0x1], 1 }

</bundles_post_ra>
